<compile_context>
chip_gen: v6e
topology: v6e:2x2x1
jax: 0.10.0
libtpu: 0.0.40
codegen_flags: <defaults>
</compile_context>

<pallas_src>
import jax
import jax.numpy as jnp
from jax.experimental import pallas as pl
from jax.experimental.pallas import tpu as pltpu


def _self_attn_pool_kernel(x_ref, w1_ref, b1_ref, w2_ref, o_ref, s_ref):
    # x_ref  : (TB, C, L)   batch tile of the input
    # w1_ref : (Ch, C)      conv1 weight (k=1 -> matmul), resident
    # b1_ref : (Ch, 1)      conv1 bias, resident
    # w2_ref : (Ch, 1)      conv2 weight as a column (VPU broadcast over L)
    # o_ref  : (TB, C)      pooled output (lane-dense store)
    # s_ref  : (TB, L) f32  VMEM scratch for attention scores
    tb = x_ref.shape[0]
    w1 = w1_ref[...]          # loaded once; weight-stationary across the tile
    b1 = b1_ref[...]
    w2 = w2_ref[...]

    def score_one(b, carry):
        xb = x_ref[b]                                              # (C, L)
        hb = jnp.dot(w1, xb, preferred_element_type=jnp.float32)   # (Ch, L) MXU
        hb = jnp.maximum(hb + b1, 0.0)                             # bias + ReLU
        # Conv1d(C//2 -> 1, k=1) as VPU multiply + sublane reduce (no MXU pop
        # on the softmax critical path).  b2 omitted: softmax over L is
        # shift-invariant, so a constant bias cannot change the output.
        s_ref[pl.ds(b, 1), :] = jnp.sum(hb * w2, axis=0, keepdims=True)
        return carry

    jax.lax.fori_loop(0, tb, score_one, 0, unroll=tb <= 16)

    # Numerically stable softmax over L (all f32).
    s = s_ref[...]                                                 # (TB, L)
    s = s - jnp.max(s, axis=-1, keepdims=True)
    e = jnp.exp(s)
    attn = e * pl.reciprocal(jnp.sum(e, axis=-1, keepdims=True), approx=True)

    # Attention-weighted pooling over L -> lane-dense (TB, C) store.
    pooled = jnp.sum(x_ref[...] * attn[:, None, :], axis=-1)       # (TB, C)
    o_ref[...] = pooled.astype(o_ref.dtype)


def _tpu_vmem_capacity_bytes():
    try:
        return int(pltpu.get_tpu_info().vmem_capacity_bytes)
    except Exception:
        return 64 << 20  # conservative (v7x-like) if the query is unavailable


def _live_bytes(tb, C, L, itemsize):
    """Approximate per-step VMEM live set for a batch tile of size tb."""
    ch = max(C // 2, 1)
    x_tile = tb * C * L * itemsize
    return (3 * x_tile            # 2 pipeline buffers + fused x*attn intermediates
            + 3 * tb * L * 4      # score scratch + exp + attn rows (f32)
            + ch * L * 4          # per-batch hidden block
            + 2 * tb * C * 4)     # pooled + double-buffered output


def _pick_block_b(B, C, L, itemsize):
    """Pick the batch tile TB and the VMEM limit to request (generation-aware)."""
    cap = _tpu_vmem_capacity_bytes()
    dual_tc = cap <= (64 << 20)   # v7x-like: 64 MiB VMEM per TC, 2 TCs/chip
    vmem_limit = min((48 << 20) if dual_tc else (96 << 20), (cap * 3) // 4)
    budget = int(vmem_limit * 0.8)  # headroom for compiler scratch / vregs

    divisors = [d for d in range(1, B + 1) if B % d == 0]
    # (TB, C) output block needs TB % 8 == 0 unless TB spans the full batch.
    aligned = [d for d in divisors if d % 8 == 0 or d == B]
    fits = [d for d in aligned if _live_bytes(d, C, L, itemsize) <= budget]

    if fits:
        if dual_tc:
            # 2 TensorCores share the "parallel" batch axis: prefer an even
            # number of grid steps >= 4 (both cores fed, >= 2 steps each of
            # prefetch/writeback overlap), then >= 2, then whatever fits.
            for ok in (lambda n: n >= 4 and n % 2 == 0,
                       lambda n: n >= 2,
                       lambda n: True):
                cands = [d for d in fits if ok(B // d)]
                if cands:
                    return max(cands), int(vmem_limit)
        # Single TC (v5e/v6e): no megacore constraint — largest tile that fits
        # (fewer, bigger DMAs amortize per-step overhead; grid=1 is fine).
        return max(fits), int(vmem_limit)

    # Nothing fits the budget (very large C*L): fall back to the smallest
    # aligned tile and raise the requested limit to cover it.
    # TODO(synk): replace this fallback with the L-tiled online-softmax path.
    tb = min(aligned)
    need = _live_bytes(tb, C, L, itemsize) + (4 << 20)
    vmem_limit = max(vmem_limit, min(need, cap - (4 << 20)))
    return tb, int(vmem_limit)


def self_attention_pool(x, w1, b1, w2, b2=None, *, block_b=None):
    """x: (B, C, L) -> (B, C, 1), matching SelfAttentionPool.forward."""
    B, C, L = x.shape
    Ch = C // 2
    assert w1.shape == (Ch, C) and b1.shape == (Ch, 1)
    assert w2.shape == (1, Ch)
    if b2 is not None:
        # Accepted for API fidelity; mathematically a no-op for the output
        # (softmax shift invariance), so it is not passed into the kernel.
        assert b2.shape == (1, 1)
    # NOTE: L is the lane axis for x / scores / attn; L % 128 == 0 keeps all
    # lane work unmasked.  Other L still works (full-extent blocks) but wastes
    # masked lanes.

    itemsize = jnp.dtype(x.dtype).itemsize
    auto_tb, vmem_limit = _pick_block_b(B, C, L, itemsize)
    tb = block_b if block_b is not None else auto_tb
    assert B % tb == 0, (B, tb)

    w2_col = w2.reshape(Ch, 1)  # column layout for broadcast over L inside kernel

    out2d = pl.pallas_call(
        _self_attn_pool_kernel,
        out_shape=jax.ShapeDtypeStruct((B, C), x.dtype),
        grid_spec=pltpu.PrefetchScalarGridSpec(
            num_scalar_prefetch=0,
            grid=(B // tb,),
            in_specs=[
                # x: TB batches per step — keeping this DMA large is the lever
                # that matters for this HBM-bound kernel.
                pl.BlockSpec((tb, C, L), lambda b: (b, 0, 0)),
                # Resident weights (constant index_map).
                pl.BlockSpec((Ch, C), lambda b: (0, 0)),
                pl.BlockSpec((Ch, 1), lambda b: (0, 0)),
                pl.BlockSpec((Ch, 1), lambda b: (0, 0)),
            ],
            out_specs=pl.BlockSpec((tb, C), lambda b: (b, 0)),  # lane-dense output
            scratch_shapes=[pltpu.VMEM((tb, L), jnp.float32)],  # score scratch
        ),
        compiler_params=pltpu.CompilerParams(
            dimension_semantics=("parallel",),
            vmem_limit_bytes=int(vmem_limit),
        ),
    )(x, w1, b1, w2_col)

    return out2d[:, :, None]  # (B, C, 1), matches the PyTorch module output


def _reference(x, w1, b1, w2, b2):
    """Pure-JAX reference matching the PyTorch module."""
    h = jnp.maximum(jnp.einsum("hc,bcl->bhl", w1, x) + b1[None], 0.0)
    # conv2 (k=1, out_channels=1) written as multiply + reduce so the reference
    # arithmetic matches the kernel's f32 VPU path (no extra MXU rounding).
    s = jnp.sum(h * w2.reshape(1, -1, 1), axis=1, keepdims=True) + b2[None]
    attn = jax.nn.softmax(s, axis=-1)
    return jnp.sum(x * attn, axis=-1, keepdims=True)


def _snap_bf16(a):
    # Snap test data to bf16-representable values so the conv1 matmul agrees
    # between the MXU (bf16-pass) and the XLA reference regardless of the
    # default matmul precision on either side.
    return a.astype(jnp.bfloat16).astype(jnp.float32)


if __name__ == "__main__":
    # Small shapes consistent with the module (Conv1d expects (B, C, L)).
    # L is a multiple of 128 (lane-aligned); B=16 leaves the tiler free to
    # pick 1 or 2 grid steps depending on the detected TPU generation.
    B, C, L = 16, 16, 128
    Ch = C // 2

    key = jax.random.PRNGKey(0)
    kx, k1, k2, k3, k4 = jax.random.split(key, 5)

    x = _snap_bf16(jax.random.normal(kx, (B, C, L), dtype=jnp.float32))
    # Conv1d k=1 weights flattened to matmul form.
    w1 = _snap_bf16(jax.random.normal(k1, (Ch, C), dtype=jnp.float32)
                    * (1.0 / jnp.sqrt(C)))
    b1 = _snap_bf16(jax.random.normal(k2, (Ch, 1), dtype=jnp.float32) * 0.01)
    w2 = _snap_bf16(jax.random.normal(k3, (1, Ch), dtype=jnp.float32)
                    * (1.0 / jnp.sqrt(Ch)))
    b2 = _snap_bf16(jax.random.normal(k4, (1, 1), dtype=jnp.float32) * 0.01)

    out = jax.block_until_ready(self_attention_pool(x, w1, b1, w2, b2))
    ref = jax.block_until_ready(_reference(x, w1, b1, w2, b2))

    assert out.shape == (B, C, 1), out.shape
    max_err = float(jnp.max(jnp.abs(out - ref)))
    # Tolerance covers the approximate EUP reciprocal in the softmax
    # denominator plus reduction-order differences.
    assert jnp.allclose(out, ref, atol=2e-3, rtol=2e-3), max_err

    print("KERNEL_OK")
</pallas_src>

<mosaic_0001>
module attributes {stable_mosaic.version = 11 : i64} {
  func.func @_self_attn_pool_kernel(%arg0: i32, %arg1: memref<8x16x128xf32, #tpu.memory_space<vmem>>, %arg2: memref<8x16xf32, #tpu.memory_space<vmem>>, %arg3: memref<8x1xf32, #tpu.memory_space<vmem>>, %arg4: memref<8x1xf32, #tpu.memory_space<vmem>>, %arg5: memref<8x16xf32, #tpu.memory_space<vmem>>, %arg6: memref<8x128xf32, #tpu.memory_space<vmem>>) attributes {dimension_semantics = [#tpu.dimension_semantics<parallel>], iteration_bounds = array<i64: 2>, scalar_prefetch = 0 : i64, scratch_operands = 1 : i64, tpu.core_type = #tpu.core_type<tc>, window_params = [{transform_indices = @transform_0, window_bounds = array<i64: 8, 16, 128>}, {pipeline_mode = #tpu.pipeline_mode<synchronous>, transform_indices = @transform_1, window_bounds = array<i64: 8, 16>}, {pipeline_mode = #tpu.pipeline_mode<synchronous>, transform_indices = @transform_2, window_bounds = array<i64: 8, 1>}, {pipeline_mode = #tpu.pipeline_mode<synchronous>, transform_indices = @transform_3, window_bounds = array<i64: 8, 1>}, {transform_indices = @transform_4, window_bounds = array<i64: 8, 16>}]} {
    %c0 = arith.constant 0 : index
    %c0_0 = arith.constant 0 : index
    %0 = vector.load %arg2[%c0, %c0_0] : memref<8x16xf32, #tpu.memory_space<vmem>>, vector<8x16xf32>
    %c0_1 = arith.constant 0 : index
    %c0_2 = arith.constant 0 : index
    %1 = vector.load %arg3[%c0_1, %c0_2] : memref<8x1xf32, #tpu.memory_space<vmem>>, vector<8x1xf32>
    %c0_3 = arith.constant 0 : index
    %c0_4 = arith.constant 0 : index
    %2 = vector.load %arg4[%c0_3, %c0_4] : memref<8x1xf32, #tpu.memory_space<vmem>>, vector<8x1xf32>
    %c0_i32 = arith.constant 0 : i32
    %3 = arith.index_cast %c0_i32 : i32 to index
    %c0_5 = arith.constant 0 : index
    %c0_6 = arith.constant 0 : index
    %4 = vector.load %arg1[%3, %c0_5, %c0_6] : memref<8x16x128xf32, #tpu.memory_space<vmem>>, vector<1x16x128xf32>
    %5 = vector.shape_cast %4 : vector<1x16x128xf32> to vector<16x128xf32>
    %cst = arith.constant dense<0.000000e+00> : vector<8x128xf32>
    %6 = tpu.matmul %0, %5, %cst {dimension_numbers = #tpu.dot_dimension_numbers<[1], [0], [0], [1], [0, 0, 1, 1], [], []>} : vector<8x16xf32>, vector<16x128xf32>, vector<8x128xf32> -> vector<8x128xf32>
    %7 = vector.broadcast %1 : vector<8x1xf32> to vector<8x128xf32>
    %8 = arith.addf %6, %7 : vector<8x128xf32>
    %cst_7 = arith.constant 0.000000e+00 : f32
    %9 = vector.broadcast %cst_7 : f32 to vector<8x128xf32>
    %10 = arith.maximumf %8, %9 : vector<8x128xf32>
    %11 = vector.broadcast %2 : vector<8x1xf32> to vector<8x128xf32>
    %12 = arith.mulf %10, %11 : vector<8x128xf32>
    %cst_8 = arith.constant dense<0.000000e+00> : vector<128xf32>
    %13 = vector.multi_reduction <add>, %12, %cst_8 [0] : vector<8x128xf32> to vector<128xf32>
    %14 = vector.shape_cast %13 : vector<128xf32> to vector<1x128xf32>
    %15 = arith.index_cast %c0_i32 : i32 to index
    %c0_9 = arith.constant 0 : index
    %16 = vector.load %arg6[%15, %c0_9] : memref<8x128xf32, #tpu.memory_space<vmem>>, vector<1x128xf32>
    tpu.vector_store %arg6[%15, %c0_9], %14 {strides = array<i32>} : memref<8x128xf32, #tpu.memory_space<vmem>>, vector<1x128xf32>,
    %c1_i32 = arith.constant 1 : i32
    %17 = arith.index_cast %c1_i32 : i32 to index
    %c0_10 = arith.constant 0 : index
    %c0_11 = arith.constant 0 : index
    %18 = vector.load %arg1[%17, %c0_10, %c0_11] : memref<8x16x128xf32, #tpu.memory_space<vmem>>, vector<1x16x128xf32>
    %19 = vector.shape_cast %18 : vector<1x16x128xf32> to vector<16x128xf32>
    %cst_12 = arith.constant dense<0.000000e+00> : vector<8x128xf32>
    %20 = tpu.matmul %0, %19, %cst_12 {dimension_numbers = #tpu.dot_dimension_numbers<[1], [0], [0], [1], [0, 0, 1, 1], [], []>} : vector<8x16xf32>, vector<16x128xf32>, vector<8x128xf32> -> vector<8x128xf32>
    %21 = vector.broadcast %1 : vector<8x1xf32> to vector<8x128xf32>
    %22 = arith.addf %20, %21 : vector<8x128xf32>
    %cst_13 = arith.constant 0.000000e+00 : f32
    %23 = vector.broadcast %cst_13 : f32 to vector<8x128xf32>
    %24 = arith.maximumf %22, %23 : vector<8x128xf32>
    %25 = vector.broadcast %2 : vector<8x1xf32> to vector<8x128xf32>
    %26 = arith.mulf %24, %25 : vector<8x128xf32>
    %cst_14 = arith.constant dense<0.000000e+00> : vector<128xf32>
    %27 = vector.multi_reduction <add>, %26, %cst_14 [0] : vector<8x128xf32> to vector<128xf32>
    %28 = vector.shape_cast %27 : vector<128xf32> to vector<1x128xf32>
    %29 = arith.index_cast %c1_i32 : i32 to index
    %c0_15 = arith.constant 0 : index
    %30 = vector.load %arg6[%29, %c0_15] : memref<8x128xf32, #tpu.memory_space<vmem>>, vector<1x128xf32>
    tpu.vector_store %arg6[%29, %c0_15], %28 {strides = array<i32>} : memref<8x128xf32, #tpu.memory_space<vmem>>, vector<1x128xf32>,
    %c2_i32 = arith.constant 2 : i32
    %31 = arith.index_cast %c2_i32 : i32 to index
    %c0_16 = arith.constant 0 : index
    %c0_17 = arith.constant 0 : index
    %32 = vector.load %arg1[%31, %c0_16, %c0_17] : memref<8x16x128xf32, #tpu.memory_space<vmem>>, vector<1x16x128xf32>
    %33 = vector.shape_cast %32 : vector<1x16x128xf32> to vector<16x128xf32>
    %cst_18 = arith.constant dense<0.000000e+00> : vector<8x128xf32>
    %34 = tpu.matmul %0, %33, %cst_18 {dimension_numbers = #tpu.dot_dimension_numbers<[1], [0], [0], [1], [0, 0, 1, 1], [], []>} : vector<8x16xf32>, vector<16x128xf32>, vector<8x128xf32> -> vector<8x128xf32>
    %35 = vector.broadcast %1 : vector<8x1xf32> to vector<8x128xf32>
    %36 = arith.addf %34, %35 : vector<8x128xf32>
    %cst_19 = arith.constant 0.000000e+00 : f32
    %37 = vector.broadcast %cst_19 : f32 to vector<8x128xf32>
    %38 = arith.maximumf %36, %37 : vector<8x128xf32>
    %39 = vector.broadcast %2 : vector<8x1xf32> to vector<8x128xf32>
    %40 = arith.mulf %38, %39 : vector<8x128xf32>
    %cst_20 = arith.constant dense<0.000000e+00> : vector<128xf32>
    %41 = vector.multi_reduction <add>, %40, %cst_20 [0] : vector<8x128xf32> to vector<128xf32>
    %42 = vector.shape_cast %41 : vector<128xf32> to vector<1x128xf32>
    %43 = arith.index_cast %c2_i32 : i32 to index
    %c0_21 = arith.constant 0 : index
    %44 = vector.load %arg6[%43, %c0_21] : memref<8x128xf32, #tpu.memory_space<vmem>>, vector<1x128xf32>
    tpu.vector_store %arg6[%43, %c0_21], %42 {strides = array<i32>} : memref<8x128xf32, #tpu.memory_space<vmem>>, vector<1x128xf32>,
    %c3_i32 = arith.constant 3 : i32
    %45 = arith.index_cast %c3_i32 : i32 to index
    %c0_22 = arith.constant 0 : index
    %c0_23 = arith.constant 0 : index
    %46 = vector.load %arg1[%45, %c0_22, %c0_23] : memref<8x16x128xf32, #tpu.memory_space<vmem>>, vector<1x16x128xf32>
    %47 = vector.shape_cast %46 : vector<1x16x128xf32> to vector<16x128xf32>
    %cst_24 = arith.constant dense<0.000000e+00> : vector<8x128xf32>
    %48 = tpu.matmul %0, %47, %cst_24 {dimension_numbers = #tpu.dot_dimension_numbers<[1], [0], [0], [1], [0, 0, 1, 1], [], []>} : vector<8x16xf32>, vector<16x128xf32>, vector<8x128xf32> -> vector<8x128xf32>
    %49 = vector.broadcast %1 : vector<8x1xf32> to vector<8x128xf32>
    %50 = arith.addf %48, %49 : vector<8x128xf32>
    %cst_25 = arith.constant 0.000000e+00 : f32
    %51 = vector.broadcast %cst_25 : f32 to vector<8x128xf32>
    %52 = arith.maximumf %50, %51 : vector<8x128xf32>
    %53 = vector.broadcast %2 : vector<8x1xf32> to vector<8x128xf32>
    %54 = arith.mulf %52, %53 : vector<8x128xf32>
    %cst_26 = arith.constant dense<0.000000e+00> : vector<128xf32>
    %55 = vector.multi_reduction <add>, %54, %cst_26 [0] : vector<8x128xf32> to vector<128xf32>
    %56 = vector.shape_cast %55 : vector<128xf32> to vector<1x128xf32>
    %57 = arith.index_cast %c3_i32 : i32 to index
    %c0_27 = arith.constant 0 : index
    %58 = vector.load %arg6[%57, %c0_27] : memref<8x128xf32, #tpu.memory_space<vmem>>, vector<1x128xf32>
    tpu.vector_store %arg6[%57, %c0_27], %56 {strides = array<i32>} : memref<8x128xf32, #tpu.memory_space<vmem>>, vector<1x128xf32>,
    %c4_i32 = arith.constant 4 : i32
    %59 = arith.index_cast %c4_i32 : i32 to index
    %c0_28 = arith.constant 0 : index
    %c0_29 = arith.constant 0 : index
    %60 = vector.load %arg1[%59, %c0_28, %c0_29] : memref<8x16x128xf32, #tpu.memory_space<vmem>>, vector<1x16x128xf32>
    %61 = vector.shape_cast %60 : vector<1x16x128xf32> to vector<16x128xf32>
    %cst_30 = arith.constant dense<0.000000e+00> : vector<8x128xf32>
    %62 = tpu.matmul %0, %61, %cst_30 {dimension_numbers = #tpu.dot_dimension_numbers<[1], [0], [0], [1], [0, 0, 1, 1], [], []>} : vector<8x16xf32>, vector<16x128xf32>, vector<8x128xf32> -> vector<8x128xf32>
    %63 = vector.broadcast %1 : vector<8x1xf32> to vector<8x128xf32>
    %64 = arith.addf %62, %63 : vector<8x128xf32>
    %cst_31 = arith.constant 0.000000e+00 : f32
    %65 = vector.broadcast %cst_31 : f32 to vector<8x128xf32>
    %66 = arith.maximumf %64, %65 : vector<8x128xf32>
    %67 = vector.broadcast %2 : vector<8x1xf32> to vector<8x128xf32>
    %68 = arith.mulf %66, %67 : vector<8x128xf32>
    %cst_32 = arith.constant dense<0.000000e+00> : vector<128xf32>
    %69 = vector.multi_reduction <add>, %68, %cst_32 [0] : vector<8x128xf32> to vector<128xf32>
    %70 = vector.shape_cast %69 : vector<128xf32> to vector<1x128xf32>
    %71 = arith.index_cast %c4_i32 : i32 to index
    %c0_33 = arith.constant 0 : index
    %72 = vector.load %arg6[%71, %c0_33] : memref<8x128xf32, #tpu.memory_space<vmem>>, vector<1x128xf32>
    tpu.vector_store %arg6[%71, %c0_33], %70 {strides = array<i32>} : memref<8x128xf32, #tpu.memory_space<vmem>>, vector<1x128xf32>,
    %c5_i32 = arith.constant 5 : i32
    %73 = arith.index_cast %c5_i32 : i32 to index
    %c0_34 = arith.constant 0 : index
    %c0_35 = arith.constant 0 : index
    %74 = vector.load %arg1[%73, %c0_34, %c0_35] : memref<8x16x128xf32, #tpu.memory_space<vmem>>, vector<1x16x128xf32>
    %75 = vector.shape_cast %74 : vector<1x16x128xf32> to vector<16x128xf32>
    %cst_36 = arith.constant dense<0.000000e+00> : vector<8x128xf32>
    %76 = tpu.matmul %0, %75, %cst_36 {dimension_numbers = #tpu.dot_dimension_numbers<[1], [0], [0], [1], [0, 0, 1, 1], [], []>} : vector<8x16xf32>, vector<16x128xf32>, vector<8x128xf32> -> vector<8x128xf32>
    %77 = vector.broadcast %1 : vector<8x1xf32> to vector<8x128xf32>
    %78 = arith.addf %76, %77 : vector<8x128xf32>
    %cst_37 = arith.constant 0.000000e+00 : f32
    %79 = vector.broadcast %cst_37 : f32 to vector<8x128xf32>
    %80 = arith.maximumf %78, %79 : vector<8x128xf32>
    %81 = vector.broadcast %2 : vector<8x1xf32> to vector<8x128xf32>
    %82 = arith.mulf %80, %81 : vector<8x128xf32>
    %cst_38 = arith.constant dense<0.000000e+00> : vector<128xf32>
    %83 = vector.multi_reduction <add>, %82, %cst_38 [0] : vector<8x128xf32> to vector<128xf32>
    %84 = vector.shape_cast %83 : vector<128xf32> to vector<1x128xf32>
    %85 = arith.index_cast %c5_i32 : i32 to index
    %c0_39 = arith.constant 0 : index
    %86 = vector.load %arg6[%85, %c0_39] : memref<8x128xf32, #tpu.memory_space<vmem>>, vector<1x128xf32>
    tpu.vector_store %arg6[%85, %c0_39], %84 {strides = array<i32>} : memref<8x128xf32, #tpu.memory_space<vmem>>, vector<1x128xf32>,
    %c6_i32 = arith.constant 6 : i32
    %87 = arith.index_cast %c6_i32 : i32 to index
    %c0_40 = arith.constant 0 : index
    %c0_41 = arith.constant 0 : index
    %88 = vector.load %arg1[%87, %c0_40, %c0_41] : memref<8x16x128xf32, #tpu.memory_space<vmem>>, vector<1x16x128xf32>
    %89 = vector.shape_cast %88 : vector<1x16x128xf32> to vector<16x128xf32>
    %cst_42 = arith.constant dense<0.000000e+00> : vector<8x128xf32>
    %90 = tpu.matmul %0, %89, %cst_42 {dimension_numbers = #tpu.dot_dimension_numbers<[1], [0], [0], [1], [0, 0, 1, 1], [], []>} : vector<8x16xf32>, vector<16x128xf32>, vector<8x128xf32> -> vector<8x128xf32>
    %91 = vector.broadcast %1 : vector<8x1xf32> to vector<8x128xf32>
    %92 = arith.addf %90, %91 : vector<8x128xf32>
    %cst_43 = arith.constant 0.000000e+00 : f32
    %93 = vector.broadcast %cst_43 : f32 to vector<8x128xf32>
    %94 = arith.maximumf %92, %93 : vector<8x128xf32>
    %95 = vector.broadcast %2 : vector<8x1xf32> to vector<8x128xf32>
    %96 = arith.mulf %94, %95 : vector<8x128xf32>
    %cst_44 = arith.constant dense<0.000000e+00> : vector<128xf32>
    %97 = vector.multi_reduction <add>, %96, %cst_44 [0] : vector<8x128xf32> to vector<128xf32>
    %98 = vector.shape_cast %97 : vector<128xf32> to vector<1x128xf32>
    %99 = arith.index_cast %c6_i32 : i32 to index
    %c0_45 = arith.constant 0 : index
    %100 = vector.load %arg6[%99, %c0_45] : memref<8x128xf32, #tpu.memory_space<vmem>>, vector<1x128xf32>
    tpu.vector_store %arg6[%99, %c0_45], %98 {strides = array<i32>} : memref<8x128xf32, #tpu.memory_space<vmem>>, vector<1x128xf32>,
    %c7_i32 = arith.constant 7 : i32
    %101 = arith.index_cast %c7_i32 : i32 to index
    %c0_46 = arith.constant 0 : index
    %c0_47 = arith.constant 0 : index
    %102 = vector.load %arg1[%101, %c0_46, %c0_47] : memref<8x16x128xf32, #tpu.memory_space<vmem>>, vector<1x16x128xf32>
    %103 = vector.shape_cast %102 : vector<1x16x128xf32> to vector<16x128xf32>
    %cst_48 = arith.constant dense<0.000000e+00> : vector<8x128xf32>
    %104 = tpu.matmul %0, %103, %cst_48 {dimension_numbers = #tpu.dot_dimension_numbers<[1], [0], [0], [1], [0, 0, 1, 1], [], []>} : vector<8x16xf32>, vector<16x128xf32>, vector<8x128xf32> -> vector<8x128xf32>
    %105 = vector.broadcast %1 : vector<8x1xf32> to vector<8x128xf32>
    %106 = arith.addf %104, %105 : vector<8x128xf32>
    %cst_49 = arith.constant 0.000000e+00 : f32
    %107 = vector.broadcast %cst_49 : f32 to vector<8x128xf32>
    %108 = arith.maximumf %106, %107 : vector<8x128xf32>
    %109 = vector.broadcast %2 : vector<8x1xf32> to vector<8x128xf32>
    %110 = arith.mulf %108, %109 : vector<8x128xf32>
    %cst_50 = arith.constant dense<0.000000e+00> : vector<128xf32>
    %111 = vector.multi_reduction <add>, %110, %cst_50 [0] : vector<8x128xf32> to vector<128xf32>
    %112 = vector.shape_cast %111 : vector<128xf32> to vector<1x128xf32>
    %113 = arith.index_cast %c7_i32 : i32 to index
    %c0_51 = arith.constant 0 : index
    %114 = vector.load %arg6[%113, %c0_51] : memref<8x128xf32, #tpu.memory_space<vmem>>, vector<1x128xf32>
    tpu.vector_store %arg6[%113, %c0_51], %112 {strides = array<i32>} : memref<8x128xf32, #tpu.memory_space<vmem>>, vector<1x128xf32>,
    %c8_i32 = arith.constant 8 : i32
    %c0_52 = arith.constant 0 : index
    %c0_53 = arith.constant 0 : index
    %115 = vector.load %arg6[%c0_52, %c0_53] : memref<8x128xf32, #tpu.memory_space<vmem>>, vector<8x128xf32>
    %cst_54 = arith.constant dense<0xFF800000> : vector<8xf32>
    %116 = vector.multi_reduction <maximumf>, %115, %cst_54 [1] : vector<8x128xf32> to vector<8xf32>
    %117 = vector.shape_cast %116 : vector<8xf32> to vector<8x1xf32>
    %118 = vector.broadcast %117 : vector<8x1xf32> to vector<8x128xf32>
    %119 = arith.subf %115, %118 : vector<8x128xf32>
    %120 = math.exp %119 : vector<8x128xf32>
    %cst_55 = arith.constant dense<0.000000e+00> : vector<8xf32>
    %121 = vector.multi_reduction <add>, %120, %cst_55 [1] : vector<8x128xf32> to vector<8xf32>
    %122 = vector.shape_cast %121 : vector<8xf32> to vector<8x1xf32>
    %123 = tpu.reciprocal %122 {approx = true} : vector<8x1xf32> -> vector<8x1xf32>
    %124 = vector.broadcast %123 : vector<8x1xf32> to vector<8x128xf32>
    %125 = arith.mulf %120, %124 : vector<8x128xf32>
    %c0_56 = arith.constant 0 : index
    %c0_57 = arith.constant 0 : index
    %c0_58 = arith.constant 0 : index
    %126 = vector.load %arg1[%c0_56, %c0_57, %c0_58] : memref<8x16x128xf32, #tpu.memory_space<vmem>>, vector<8x16x128xf32>
    %127 = vector.shape_cast %125 : vector<8x128xf32> to vector<8x1x128xf32>
    %128 = vector.broadcast %127 : vector<8x1x128xf32> to vector<8x16x128xf32>
    %129 = arith.mulf %126, %128 : vector<8x16x128xf32>
    %cst_59 = arith.constant dense<0.000000e+00> : vector<8x16xf32>
    %130 = vector.multi_reduction <add>, %129, %cst_59 [2] : vector<8x16x128xf32> to vector<8x16xf32>
    %c0_60 = arith.constant 0 : index
    %c0_61 = arith.constant 0 : index
    %131 = vector.load %arg5[%c0_60, %c0_61] : memref<8x16xf32, #tpu.memory_space<vmem>>, vector<8x16xf32>
    tpu.vector_store %arg5[%c0_60, %c0_61], %130 {strides = array<i32>} : memref<8x16xf32, #tpu.memory_space<vmem>>, vector<8x16xf32>,
    return
  }
  func.func @transform_0(%arg0: i32) -> (i32, i32, i32) {
    %c0_i32 = arith.constant 0 : i32
    %c0_i32_0 = arith.constant 0 : i32
    %c0_i32_1 = arith.constant 0 : i32
    return %arg0, %c0_i32, %c0_i32_0 : i32, i32, i32
  }
  func.func @transform_1(%arg0: i32) -> (i32, i32) {
    %c0_i32 = arith.constant 0 : i32
    %c0_i32_0 = arith.constant 0 : i32
    %c0_i32_1 = arith.constant 0 : i32
    return %c0_i32, %c0_i32_0 : i32, i32
  }
  func.func @transform_2(%arg0: i32) -> (i32, i32) {
    %c0_i32 = arith.constant 0 : i32
    %c0_i32_0 = arith.constant 0 : i32
    %c0_i32_1 = arith.constant 0 : i32
    return %c0_i32, %c0_i32_0 : i32, i32
  }
  func.func @transform_3(%arg0: i32) -> (i32, i32) {
    %c0_i32 = arith.constant 0 : i32
    %c0_i32_0 = arith.constant 0 : i32
    %c0_i32_1 = arith.constant 0 : i32
    return %c0_i32, %c0_i32_0 : i32, i32
  }
  func.func @transform_4(%arg0: i32) -> (i32, i32) {
    %c0_i32 = arith.constant 0 : i32
    %c0_i32_0 = arith.constant 0 : i32
    return %arg0, %c0_i32 : i32, i32
  }
}

</mosaic_0001>

<bundles_post_ra>
// kernel: tpu_custom_call.1
= control target key start
LH: loop header
LB: loop body
LE: loop exit
PB: predicated region body
PF: predicated region fallthrough
CT: control target
= control target key end

     0   :  { %9 = vsyncpa [#allocation4], 0  ;;  %s1853_s0 = inlined_call_operand.hbm [shape: f32[16,16,128], index: 0, kind: input, shape index: {}]   ;;  %s1854_s1 = inlined_call_operand.vmem [shape: f32[8,16], index: 1, kind: input, shape index: {}]   ;;  %s1855_s2 = inlined_call_operand.vmem [shape: f32[8,1], index: 2, kind: input, shape index: {}]   ;;  %s1856_s3 = inlined_call_operand.vmem [shape: f32[8,1], index: 3, kind: input, shape index: {}]   ;;  %s1857_s4 = inlined_call_operand.hbm [shape: f32[16,16], index: 4, kind: output, shape index: {}]  }
   0x1   :  { %11 = vsyncpa [#allocation4 + $0x1], 0 }
   0x2   :  { %12 = vsyncpa [#allocation5], 0 }
   0x3   :  { %14 = vsyncpa [#allocation5 + $0x1], 0  ;;  %s1548_s15 = smov 0   ;;  %s1550_s16 = smov 0  }
   0x4   :  { %s1552_s17 = smov 0   ;;  %s1554_s18 = smov 0  }
   0x5 LB: > { %s1569_s19 = sadd.s32 4294967295, %s1513_s18   ;;  %s1246_s20 = sadd.s32 4294967294, %s1513_s18   ;;  %s1513_s18 = sphi %s1554_s18, %s1872_s18   ;;  %s1509_s17 = sphi %s1552_s17, %s1871_s17   ;;  %s1505_s16 = sphi %s1550_s16, %s1870_s16   ;;  %s1501_s15 = sphi %s1548_s15, %s1869_s15  }
   0x6   : > { %s1573_s21 = sadd.s32 1, %s1513_s18   ;;  %s27_s22 = sadd.s32 1, %s1509_s17 }
   0x7   : > { %s24_s23 = ssub.s32 %s1513_s18, %s1573_s21  ;;  %p34_p0 = scmp.ne.s32.totalorder %s1509_s17, %s1505_s16 }
   0x8   : > { %p25_p1 = scmp.eq.s32.totalorder %s24_s23, 0  ;;  %p35_p2 = scmp.eq.s32.totalorder %s1513_s18, 0 }
   0x9   : > { %p40_p3 = scmp.ne.s32.totalorder %s1505_s16, %s1501_s15  ;;  %p41_p4 = scmp.eq.s32.totalorder %s1569_s19, 0 }
   0xa   : > { %s1585_s24 = scalar_select %p25_p1, %s1509_s17, %s27_s22  }
   0xb   : > { %p1587_p5 = por %p35_p2, %p34_p0  ;;  %p1591_p6 = por %p41_p4, %p40_p3 }
   0xc   : > { %p127_p7 = scmp.eq.s32.totalorder %s1569_s19, 1  ;;  %p133_p8 = scmp.eq.s32.totalorder %s1246_s20, 1 }
   0xd   : > { %s1861_s26 = scalar_select %p1591_p6, 1, 0 }
   0xe   : > { %p1376_p10 = scmp.lt.s32.totalorder %s1513_s18, 2  ;;  %p1598_p11 = por %p127_p7, %p34_p0 }
   0xf   : > { %p1602_p12 = por %p133_p8, %p40_p3  ;;  %s162_s29 = sand.u32 1, %s1509_s17  }
  0x10   : > { %s1862_s27 = scalar_select %p1598_p11, 1, 0 }
  0x11   : > { %s1863_s28 = scalar_select %p1602_p12, 1, 0 }
  0x12   : > { %s1283_s30 = sshll.u32 %s1513_s18, 11  ;;  %s1249_s5 = sshll.u32 %s162_s29, 7 }
  0x13   : > { %s1611_s8 = scalar_lea.hbm %s1853_s0, %s1283_s30  ;;  %s166_s9 = scalar_lea.vmem [#allocation3], %s1249_s5 }
  0x14   : > { %s174_s10 = sshll.u32 %s166_s9, 4  ;;  %p1615_p13 = pnand %p1376_p10, %p1587_p5  ;;  %s1619_s10 = int_to_ptr.vmem [resolvable:$true] %s174_s10 }
  0x15   : > { %s1621_s12 = scalar_lea.sflag [#allocation4], %s162_s29  ;;  %s1421_s13 = scalar_lea.hbm %s1611_s8, 2048 }
  0x16   : > { %p1422_p0 = scmp.ne.s32.totalorder %s1611_s8, %s1421_s13  ;;  %p1423_p1 = pneg %p1615_p13 }
  0x17   : > { %s1426_s22 = scalar_lea.hbm %s1853_s0, 4096  ;;  %p1427_p4 = scmp.lt.s32.totalorder %s1611_s8, %s1853_s0 }
  0x18   : > { %p1424_p2 = pnand %p1423_p1, %p1422_p0  ;;  %p1428_p5 = scmp.lt.s32.totalorder %s1426_s22, %s1421_s13 }
  0x1a   : > { %p1425_p3 = pneg %p1424_p2  ;;  %p1429_p7 = por %p1428_p5, %p1427_p4 }
  0x1c   : > { %p1430_p8 = pnand %p1429_p7, %p1425_p3 }
  0x1e   : > { %1433 = shalt.err (!%p1430_p8)
}
  0x1f   : > { %s1434_s29 = scalar_lea.vmem %s1619_s10, 2048  ;;  %s1515_s30 = smov [#allocation3]  }
  0x20   : > { %p1435_p10 = scmp.ne.s32.totalorder %s1619_s10, %s1434_s29  ;;  %s1439_s5 = sshll.u32 %s1515_s30, 4  ;;  %s1440_s5 = int_to_ptr.vmem [resolvable:$false] %s1439_s5 }
  0x21   : > { %s1441_s6 = scalar_lea.vmem %s1440_s5, 4096  ;;  %p1442_p2 = scmp.lt.s32.totalorder %s1619_s10, %s1440_s5 }
  0x22   : > { %p1437_p9 = pnand %p1435_p10, %p1423_p1  ;;  %p1443_p12 = scmp.lt.s32.totalorder %s1441_s6, %s1434_s29 }
  0x24   : > { %p1438_p0 = pneg %p1437_p9  ;;  %p1444_p11 = por %p1443_p12, %p1442_p2 }
  0x26   : > { %p1445_p6 = pnand %p1444_p11, %p1438_p0 }
  0x28   : > { %1448 = shalt.err (!%p1445_p6)
}
  0x29   : > { %s1516_s7 = smov 128   ;;  %s1517_s9 = smov 8  }
  0x2a   : > { %1371 = dma.hbm_to_vmem [thread:$0]  (!%p1615_p13), %s1611_s8, 2048, %s1619_s10, %s1621_s12, %s1516_s7, %s1516_s7, %s1517_s9  }
  0x2b   : > { %p1253_p9 = scmp.ge.s32.totalorder %s1513_s18, 1  ;;  %p182_p1 = scmp.lt.s32.totalorder %s1513_s18, 3 }
  0x2d   : > { %p183_p3 = pnand %p1253_p9, %p182_p1 }
  0x2e   : > { %s1645_s13 = sand.u32 (!%p183_p3), 1, %s1505_s16   ;;  %p1865_p6 = scmp.ne.s32.totalorder (!%p183_p3), %s1861_s26, 0 }
  0x2f   : > { %186 = sbr.rel (%p183_p3) target bundleno = 810 (0x32a), region = 36  ;;  %s1254_s14 = sshll.u32 (!%p183_p3), %s1645_s13, 7 }
  0x30   : > { %s189_s20 = scalar_lea.sflag (!%p183_p3), [#allocation4], %s1645_s13  ;;  %s1649_s22 = scalar_lea.vmem (!%p183_p3), [#allocation3], %s1254_s14 }
  0x34   : > { %1492 = dma.done.wait (%p1865_p6), %s189_s20, 2048  }
  0x35   : > { %1494 = vsyncadd (%p1865_p6), %s189_s20, 4294965248  ;;  %v1518_v0 = vmov 0.0   ;;  %vm1519_vm0 = vmmov 0   ;;  %v1520_v1 = vmov 0   ;;  %v1662_v2 = vld [vmem:[%s1649_s22 + $0x8] sm:$0xff]  ;;  %v1665_v3 = vld [vmem:[%s1649_s22 + $0x18] sm:$0xff] }
  0x36   : > { %1308 = vmatprep.subr.mxu0 %v1518_v0  ;;  %1315 = vmatprep.subr.mxu1 %v1518_v0  ;;  %v1668_v4 = vld [vmem:[%s1649_s22] sm:$0xff]  ;;  %v1673_v5 = vld [vmem:[%s1649_s22 + $0x10] sm:$0xff]  ;;  %v218_v6 = vld [vmem:[%s1854_s1] sm:$0xff]  ;;  %vm228_vm1 = vcmask 130048   ;;  %vm1081_vm2 = vcmask 130112   ;;  %vm1146_vm3 = vcmask 1041409  }
  0x37   : > { %1312 = vmatprep.mubr.msk.f32.mxu0 %vm1519_vm0, %v1518_v0  ;;  %1319 = vmatprep.mubr.msk.f32.mxu1 %vm1519_vm0, %v1518_v0  ;;  %v1683_v7 = vld [vmem:[%s1649_s22 + $0x28] sm:$0xff]  ;;  %v1686_v8 = vld [vmem:[%s1649_s22 + $0x38] sm:$0xff]  ;;  %v1693_v9 = vld [vmem:[%s1649_s22 + $0x20] sm:$0xff]  ;;  %vm1148_vm4 = vcmask 1042434   ;;  %s1255_s25 = sshll.u32 %s1645_s13, 3  ;;  %vm1150_vm5 = vcmask 1043459  }
  0x38   : > { %1416 = vset.pattern.permute.xlu0 %v1520_v1  ;;  %1309 = vmatpush3.msra.mxu0 %v1662_v2  ;;  %v1698_v10 = vld [vmem:[%s1649_s22 + $0x30] sm:$0xff]  ;;  %v1709_v11 = vld [vmem:[%s1649_s22 + $0x48] sm:$0xff]  ;;  %v1712_v12 = vld [vmem:[%s1649_s22 + $0x58] sm:$0xff]  ;;  %vm1152_vm6 = vcmask 1044484   ;;  %vm1154_vm7 = vcmask 1045509   ;;  %vm1156_vm8 = vcmask 1046534  }
  0x39   : > { %1316 = vmatpush3.msra.mxu1 %v1665_v3  ;;  %1310 = vmatprep.subr.mxu0 %v1518_v0  ;;  %v1719_v13 = vld [vmem:[%s1649_s22 + $0x40] sm:$0xff]  ;;  %v1724_v14 = vld [vmem:[%s1649_s22 + $0x50] sm:$0xff]  ;;  %v1735_v15 = vld [vmem:[%s1649_s22 + $0x68] sm:$0xff]  ;;  %s1279_s29 = sshll.u32 %s1569_s19, 7  ;;  %s216_s30 = scalar_lea.vmem [#allocation6], %s1255_s25  ;;  %vm1158_vm9 = vcmask 1047559  }
  0x3a   : > { %1317 = vmatprep.subr.mxu1 %v1518_v0  ;;  %1311 = vmatpush3.msra.mxu0 %v1668_v4  ;;  %v1738_v16 = vld [vmem:[%s1649_s22 + $0x78] sm:$0xff]  ;;  %v1745_v17 = vld [vmem:[%s1649_s22 + $0x60] sm:$0xff]  ;;  %v1750_v18 = vld [vmem:[%s1649_s22 + $0x70] sm:$0xff]  ;;  %s1176_s5 = sshll.u32 %s216_s30, 4  ;;  %s1815_s9 = scalar_lea.hbm %s1857_s4, %s1279_s29  ;;  %s1177_s5 = int_to_ptr.vmem [resolvable:$true] %s1176_s5 }
  0x3b   : > { %1318 = vmatpush3.msra.mxu1 %v1673_v5  ;;  %1313 = vmatmul.mubr.msk.f32.vlgmr.msra.gmra.mxu0 %vm228_vm1, %v218_v6  ;;  %v219_v19 = vld [vmem:[%s1855_s2] sm:$0xff]  ;;  %s1163_s19 = scalar_lea.sflag [#allocation5], %s1645_s13  ;;  %s1449_s14 = scalar_lea.vmem %s1177_s5, 128 }
  0x3c   : > { %1320 = vmatmul.mubr.msk.f32.vlgmr.msra.gmra.mxu1 %vm228_vm1, %v218_v6  ;;  %1322 = vmatprep.subr.mxu0 %v1518_v0  ;;  %v220_v20 = vld [vmem:[%s1856_s3] sm:$0xff]  ;;  %p1450_p11 = scmp.ne.s32.totalorder %s1177_s5, %s1449_s14  ;;  %p1866_p12 = scmp.ne.s32.totalorder %s1862_s27, 0 }
  0x3d   : > { %1329 = vmatprep.subr.mxu1 %v1518_v0  ;;  %1323 = vmatpush3.msra.mxu0 %v1683_v7  ;;  %s1522_s20 = smov [#allocation6]  }
  0x3e   : > { %1330 = vmatpush3.msra.mxu1 %v1686_v8  ;;  %1324 = vmatprep.subr.mxu0 %v1518_v0  ;;  %p1451_p13 = pnand %p1450_p11, %p1866_p12  ;;  %s1453_s22 = sshll.u32 %s1522_s20, 4  ;;  %s1454_s22 = int_to_ptr.vmem [resolvable:$false] %s1453_s22 }
  0x3f   : > { %1331 = vmatprep.subr.mxu1 %v1518_v0  ;;  %1325 = vmatpush3.msra.mxu0 %v1693_v9  ;;  %s1455_s26 = scalar_lea.vmem %s1454_s22, 256  ;;  %p1456_p5 = scmp.lt.s32.totalorder %s1177_s5, %s1454_s22 }
  0x40   : > { %1326 = vmatprep.mubr.msk.f32.mxu0 %vm1519_vm0, %v1518_v0  ;;  %1332 = vmatpush3.msra.mxu1 %v1698_v10  ;;  %p1452_p4 = pneg %p1451_p13  ;;  %p1457_p7 = scmp.lt.s32.totalorder %s1455_s26, %s1449_s14 }
  0x41   : > { %1333 = vmatprep.mubr.msk.f32.mxu1 %vm1519_vm0, %v1518_v0  ;;  %1327 = vmatmul.mubr.msk.f32.vlgmr.msra.gmra.mxu0 %vm228_vm1, %v218_v6 }
  0x42   : > { %1334 = vmatmul.mubr.msk.f32.vlgmr.msra.gmra.mxu1 %vm228_vm1, %v218_v6  ;;  %1336 = vmatprep.subr.mxu0 %v1518_v0  ;;  %p1458_p8 = por %p1457_p7, %p1456_p5 }
  0x43   : > { %1343 = vmatprep.subr.mxu1 %v1518_v0  ;;  %1337 = vmatpush3.msra.mxu0 %v1709_v11 }
  0x44   : > { %1344 = vmatpush3.msra.mxu1 %v1712_v12  ;;  %1338 = vmatprep.subr.mxu0 %v1518_v0  ;;  %p1459_p10 = pnand %p1458_p8, %p1452_p4 }
  0x45   : > { %1345 = vmatprep.subr.mxu1 %v1518_v0  ;;  %1339 = vmatpush3.msra.mxu0 %v1719_v13 }
  0x46   : > { %1340 = vmatprep.mubr.msk.f32.mxu0 %vm1519_vm0, %v1518_v0  ;;  %1346 = vmatpush3.msra.mxu1 %v1724_v14 }
  0x47   : > { %1347 = vmatprep.mubr.msk.f32.mxu1 %vm1519_vm0, %v1518_v0  ;;  %1341 = vmatmul.mubr.msk.f32.vlgmr.msra.gmra.mxu0 %vm228_vm1, %v218_v6 }
  0x48   : > { %1348 = vmatmul.mubr.msk.f32.vlgmr.msra.gmra.mxu1 %vm228_vm1, %v218_v6  ;;  %1350 = vmatprep.subr.mxu0 %v1518_v0 }
  0x49   : > { %1357 = vmatprep.subr.mxu1 %v1518_v0  ;;  %1351 = vmatpush3.msra.mxu0 %v1735_v15 }
  0x4a   : > { %1358 = vmatpush3.msra.mxu1 %v1738_v16  ;;  %1352 = vmatprep.subr.mxu0 %v1518_v0 }
  0x4b   : > { %1359 = vmatprep.subr.mxu1 %v1518_v0  ;;  %1353 = vmatpush3.msra.mxu0 %v1745_v17 }
  0x4c   : > { %1354 = vmatprep.mubr.msk.f32.mxu0 %vm1519_vm0, %v1518_v0  ;;  %1360 = vmatpush3.msra.mxu1 %v1750_v18 }
  0x4d   : > { %1361 = vmatprep.mubr.msk.f32.mxu1 %vm1519_vm0, %v1518_v0  ;;  %1355 = vmatmul.mubr.msk.f32.vlgmr.msra.gmra.mxu0 %vm228_vm1, %v218_v6 }
  0x4e   : > { %1362 = vmatmul.mubr.msk.f32.vlgmr.msra.gmra.mxu1 %vm228_vm1, %v218_v6  ;;  %225 = vperm.xlu0 %1416, %v219_v19  }
  0x52   : > { %305 = vperm.xlu0 %1416, %v220_v20  }
  0xc9   : > { %v226_v21 = vpop.permute.xlu0 %225 }
  0xcd   : > { %v1768_v26 = vpop.permute.xlu0 %305 }
  0xfb   : > { %v298_v22 = vpop.f32.mrf.mxu0 }
  0xfc   : > { %v385_v23 = vpop.f32.mrf.mxu1  ;;  %v299_v24 = vadd.f32 %v298_v22, %v226_v21 }
  0xfd   : > { %v386_v25 = vadd.f32 %v385_v23, %v226_v21  ;;  %v1314_v27 = vpop.f32.mrf.mxu0 }
  0xfe   : > { %v1321_v28 = vpop.f32.mrf.mxu1  ;;  %v302_v29 = vmax.f32 %v299_v24, 0.0 }
  0xff   : > { %v389_v30 = vmax.f32 %v386_v25, 0.0 }
 0x100   : > { %v308_v31 = vmul.f32 %v1768_v26, %v302_v29 }
 0x101   : > { %v390_v32 = vmul.f32 %v389_v30, %v1768_v26  ;;  %v467_v33 = vpop.f32.mrf.mxu0 }
 0x102   : > { %v549_v34 = vpop.f32.mrf.mxu1  ;;  %v309_v35 = vrot.slane %v308_v31, 4  ;;  %v468_v37 = vadd.f32 %v467_v33, %v226_v21 }
 0x103   : > { %v391_v36 = vrot.slane %v390_v32, 4  ;;  %v550_v38 = vadd.f32 %v549_v34, %v226_v21  ;;  %v1328_v39 = vpop.f32.mrf.mxu0 }
 0x104   : > { %v1335_v40 = vpop.f32.mrf.mxu1  ;;  %v310_v41 = vadd.f32 %v309_v35, %v308_v31  ;;  %v471_v43 = vmax.f32 %v468_v37, 0.0 }
 0x105   : > { %v392_v42 = vadd.f32 %v391_v36, %v390_v32  ;;  %v553_v44 = vmax.f32 %v550_v38, 0.0 }
 0x106   : > { %v311_v45 = vrot.slane %v310_v41, 2  ;;  %v472_v47 = vmul.f32 %v471_v43, %v1768_v26 }
 0x107   : > { %v393_v46 = vrot.slane %v392_v42, 2  ;;  %v554_v48 = vmul.f32 %v553_v44, %v1768_v26  ;;  %v631_v49 = vpop.f32.mrf.mxu0 }
 0x108   : > { %v713_v50 = vpop.f32.mrf.mxu1  ;;  %v312_v51 = vadd.f32 %v311_v45, %v310_v41  ;;  %v473_v53 = vrot.slane %v472_v47, 4  ;;  %v632_v55 = vadd.f32 %v631_v49, %v226_v21 }
 0x109   : > { %v394_v52 = vadd.f32 %v393_v46, %v392_v42  ;;  %v555_v54 = vrot.slane %v554_v48, 4  ;;  %v714_v56 = vadd.f32 %v713_v50, %v226_v21  ;;  %v1342_v57 = vpop.f32.mrf.mxu0 }
 0x10a   : > { %v1349_v58 = vpop.f32.mrf.mxu1  ;;  %v313_v59 = vrot.slane %v312_v51, 1  ;;  %v474_v61 = vadd.f32 %v473_v53, %v472_v47  ;;  %v635_v63 = vmax.f32 %v632_v55, 0.0 }
 0x10b   : > { %v395_v60 = vrot.slane %v394_v52, 1  ;;  %v556_v62 = vadd.f32 %v555_v54, %v554_v48  ;;  %v717_v0 = vmax.f32 %v714_v56, 0.0 }
 0x10c   : > { %v314_v1 = vadd.f32 %v313_v59, %v312_v51  ;;  %v475_v19 = vrot.slane %v474_v61, 2  ;;  %v636_v22 = vmul.f32 %v635_v63, %v1768_v26 }
 0x10d   : > { %v396_v6 = vadd.f32 %v395_v60, %v394_v52  ;;  %v557_v20 = vrot.slane %v556_v62, 2  ;;  %v718_v23 = vmul.f32 %v717_v0, %v1768_v26  ;;  %v795_v24 = vpop.f32.mrf.mxu0 }
 0x10e   : > { %v877_v25 = vpop.f32.mrf.mxu1  ;;  %315 = vst [vmem:[#allocation2] sm:$0x1] %v314_v1  ;;  %v476_v27 = vadd.f32 %v475_v19, %v474_v61  ;;  %v796_v29 = vadd.f32 %v795_v24, %v226_v21  ;;  %v637_v31 = vrot.slane %v636_v22, 4  ;;  %v921_v24 = vlaneseq }
 0x10f   : > { %397 = vst [vmem:[#allocation2 + $0x1] sm:$0x1] %v396_v6  ;;  %v558_v28 = vadd.f32 %v557_v20, %v556_v62  ;;  %v878_v30 = vadd.f32 %v877_v25, %v226_v21  ;;  %v719_v32 = vrot.slane %v718_v23, 4  ;;  %v1356_v33 = vpop.f32.mrf.mxu0 }
 0x110   : > { %v1363_v34 = vpop.f32.mrf.mxu1  ;;  %v477_v35 = vrot.slane %v476_v27, 1  ;;  %v799_v37 = vmax.f32 %v796_v29, 0.0  ;;  %v638_v39 = vadd.f32 %v637_v31, %v636_v22  ;;  %v1521_v22 = vmov 1966171168  }
 0x111   : > { %v559_v36 = vrot.slane %v558_v28, 1  ;;  %v881_v38 = vmax.f32 %v878_v30, 0.0  ;;  %v720_v40 = vadd.f32 %v719_v32, %v718_v23  ;;  %v919_v23 = vunpack.c.l.s4 %v1521_v22 }
 0x112   : > { %v478_v41 = vadd.f32 %v477_v35, %v476_v27  ;;  %v800_v43 = vmul.f32 %v799_v37, %v1768_v26  ;;  %v639_v45 = vrot.slane %v638_v39, 2  ;;  %v1779_v27 = vshrl.u32 %v921_v24, 7 }
 0x113   : > { %v560_v42 = vadd.f32 %v559_v36, %v558_v28  ;;  %v882_v44 = vmul.f32 %v881_v38, %v1768_v26  ;;  %v721_v46 = vrot.slane %v720_v40, 2  ;;  %v920_v25 = vunpack.c.0.s8 %v919_v23 }
 0x114   : > { %479 = vst [vmem:[#allocation2 + $0x2] sm:$0x1] %v478_v41  ;;  %v801_v21 = vrot.slane %v800_v43, 4  ;;  %v640_v48 = vadd.f32 %v639_v45, %v638_v39  ;;  %v968_v32 = vsub.s32 0, %v1779_v27 }
 0x115   : > { %561 = vst [vmem:[#allocation2 + $0x3] sm:$0x1] %v560_v42  ;;  %v883_v47 = vrot.slane %v882_v44, 4  ;;  %v722_v49 = vadd.f32 %v721_v46, %v720_v40  ;;  %v923_v28 = vsub.s32 %v920_v25, %v1779_v27 }
 0x116   : > { %v802_v50 = vadd.f32 %v801_v21, %v800_v43  ;;  %v641_v52 = vrot.slane %v640_v48, 1 }
 0x117   : > { %v884_v51 = vadd.f32 %v883_v47, %v882_v44  ;;  %v723_v53 = vrot.slane %v722_v49, 1 }
 0x118   : > { %v803_v54 = vrot.slane %v802_v50, 2  ;;  %v642_v56 = vadd.f32 %v641_v52, %v640_v48 }
 0x119   : > { %v885_v55 = vrot.slane %v884_v51, 2  ;;  %v724_v57 = vadd.f32 %v723_v53, %v722_v49 }
 0x11a   : > { %v804_v58 = vadd.f32 %v803_v54, %v802_v50  ;;  %643 = vst [vmem:[#allocation2 + $0x4] sm:$0x1] %v642_v56 }
 0x11b   : > { %v886_v59 = vadd.f32 %v885_v55, %v884_v51  ;;  %725 = vst [vmem:[#allocation2 + $0x5] sm:$0x1] %v724_v57 }
 0x11c   : > { %v805_v26 = vrot.slane %v804_v58, 1 }
 0x11d   : > { %v887_v60 = vrot.slane %v886_v59, 1 }
 0x11e   : > { %v806_v61 = vadd.f32 %v805_v26, %v804_v58 }
 0x11f   : > { %v888_v62 = vadd.f32 %v887_v60, %v886_v59 }
 0x120   : > { %807 = vst [vmem:[#allocation2 + $0x6] sm:$0x1] %v806_v61 }
 0x121   : > { %889 = vst [vmem:[#allocation2 + $0x7] sm:$0x1] %v888_v62 }
 0x128   : > { %v890_v63 = vld [vmem:[#allocation2] sm:$0xff] }
 0x129   : > { %891 = vmax.xlane.f32.xlu1 %v890_v63 }
 0x1b2   : > { %v892_v0 = vpop.xlane.xlu1 %891 }
 0x1b3   : > { %v893_v1 = vsub.f32 %v890_v63, %v892_v0 }
 0x1b5   : > { %v894_v6 = vmul.f32 1.442695, %v893_v1 }
 0x1b7   : > { %1417 = vpow2.f32 %v894_v6 }
 0x1c4   : > { %v1418_v19 = vpop.eup %1417 }
 0x1c5   : > { %896 = vadd.xlane.f32.xlu1 %v1418_v19 }
 0x24e   : > { %v897_v20 = vpop.xlane.xlu1 %896 }
 0x24f   : > { %1419 = vrcp.f32 %v897_v20 }
 0x25c   : > { %v1420_v29 = vpop.eup %1419 }
 0x25d   : > { %v899_v30 = vmul.f32 %v1420_v29, %v1418_v19 }
 0x25f   : > { %v924_v31 = vrot.slane %v899_v30, %v923_v28  ;;  %v917_v33 = vcombine.high %v899_v30, %v899_v30 }
 0x261   : > { %v940_v34 = vrot.slane %v924_v31, %v923_v28  ;;  %v932_v35 = vcombine.high %v924_v31, %v924_v31  ;;  %v931_v36 = vrot.slane %v917_v33, %v923_v28 }
 0x263   : > { %v969_v37 = vrot.slane %v940_v34, %v968_v32  ;;  %v954_v38 = vrot.slane %v932_v35, %v923_v28  ;;  %v947_v39 = vrot.slane %v931_v36, %v923_v28  ;;  %v933_v40 = vcombine.high %v931_v36, %v931_v36 }
 0x264   : > { %v962_v46 = vcombine.high %v940_v34, %v940_v34 }
 0x265   : > { %v1007_v41 = vmul.f32 %v969_v37, %v1662_v2  ;;  %v1006_v42 = vmul.f32 %v969_v37, %v1668_v4  ;;  %v973_v43 = vrot.slane %v954_v38, %v968_v32  ;;  %v985_v44 = vrot.slane %v947_v39, %v968_v32 }
 0x266   : > { %v961_v45 = vrot.slane %v933_v40, %v923_v28  ;;  %v963_v49 = vcombine.high %v947_v39, %v947_v39  ;;  %v977_v50 = vrot.slane %v962_v46, %v968_v32  ;;  %v964_v56 = vcombine.high %v954_v38, %v954_v38 }
 0x267   : > { %1024 = vadd.xlane.f32.xlu1 %v1007_v41  ;;  %1022 = vadd.xlane.f32.xlu0 %v1006_v42  ;;  %v1008_v21 = vmul.f32 %v1673_v5, %v973_v43  ;;  %v1015_v47 = vmul.f32 %v1709_v11, %v985_v44  ;;  %v1009_v51 = vmul.f32 %v1665_v3, %v973_v43 }
 0x268   : > { %v989_v48 = vrot.slane %v961_v45, %v968_v32  ;;  %v993_v4 = vrot.slane %v963_v49, %v968_v32  ;;  %v965_v52 = vcombine.high %v961_v45, %v961_v45  ;;  %v1010_v53 = vmul.f32 %v1693_v9, %v977_v50 }
 0x269   : > { %v1011_v11 = vmul.f32 %v1683_v7, %v977_v50  ;;  %v1014_v3 = vmul.f32 %v1719_v13, %v985_v44 }
 0x26a   : > { %v1017_v2 = vmul.f32 %v1712_v12, %v989_v48  ;;  %v1019_v54 = vmul.f32 %v1735_v15, %v993_v4  ;;  %v997_v5 = vrot.slane %v965_v52, %v968_v32  ;;  %v981_v12 = vrot.slane %v964_v56, %v968_v32 }
 0x26b   : > { %1026 = vadd.xlane.f32.xlu1 %v1008_v21  ;;  %1040 = vadd.xlane.f32.xlu0 %v1015_v47  ;;  %v1016_v15 = vmul.f32 %v1724_v14, %v989_v48  ;;  %v1018_v7 = vmul.f32 %v1745_v17, %v993_v4 }
 0x26c   : > { %v1021_v55 = vmul.f32 %v1738_v16, %v997_v5  ;;  %v1012_v57 = vmul.f32 %v1698_v10, %v981_v12  ;;  %v1013_v9 = vmul.f32 %v1686_v8, %v981_v12  ;;  %v1020_v16 = vmul.f32 %v1750_v18, %v997_v5 }
 0x26d   : > { %v1071_v10 = vand.u32 127, %v921_v24 }
 0x26f   : > { %1028 = vadd.xlane.f32.xlu1 %v1009_v51  ;;  %1044 = vadd.xlane.f32.xlu0 %v1017_v2  ;;  %v1076_v63 = vadd.s32 4294967288, %v1071_v10  ;;  %v1074_v17 = vsub.s32 %v1071_v10, %v1779_v27 }
 0x271   : > { %v1079_v1 = vsub.s32 %v1076_v63, %v1779_v27 }
 0x273   : > { %1030 = vadd.xlane.f32.xlu1 %v1010_v53  ;;  %1048 = vadd.xlane.f32.xlu0 %v1019_v54 }
 0x277   : > { %1032 = vadd.xlane.f32.xlu1 %v1011_v11  ;;  %1052 = vadd.xlane.f32.xlu0 %v1021_v55 }
 0x27b   : > { %1038 = vadd.xlane.f32.xlu1 %v1014_v3 }
 0x27f   : > { %1034 = vadd.xlane.f32.xlu1 %v1012_v57 }
 0x283   : > { %1036 = vadd.xlane.f32.xlu1 %v1013_v9 }
 0x287   : > { %1042 = vadd.xlane.f32.xlu1 %v1016_v15 }
 0x28b   : > { %1046 = vadd.xlane.f32.xlu1 %v1018_v7 }
 0x28f   : > { %1050 = vadd.xlane.f32.xlu1 %v1020_v16 }
 0x2f0   : > { %v1025_v58 = vpop.xlane.xlu1 %1024  ;;  %v1023_v60 = vpop.xlane.xlu0 %1022 }
 0x2f1   : > { %v1080_v20 = vrot.slane %v1025_v58, %v1079_v1  ;;  %v1075_v22 = vrot.slane %v1023_v60, %v1074_v17 }
 0x2f3   : > { %v1082_v27 = vsel %vm1081_vm2, %v1080_v20, %v1075_v22 }
 0x2f4   : > { %v1027_v59 = vpop.xlane.xlu1 %1026  ;;  %v1041_v62 = vpop.xlane.xlu0 %1040 }
 0x2f5   : > { %v1086_v23 = vrot.slane %v1027_v59, %v1074_v17  ;;  %v1117_v41 = vrot.slane %v1041_v62, %v1079_v1 }
 0x2f8   : > { %v1029_v13 = vpop.xlane.xlu1 %1028  ;;  %v1045_v14 = vpop.xlane.xlu0 %1044 }
 0x2f9   : > { %v1090_v18 = vrot.slane %v1029_v13, %v1079_v1  ;;  %v1126_v38 = vrot.slane %v1045_v14, %v1079_v1 }
 0x2fb   : > { %v1091_v30 = vsel %vm1081_vm2, %v1090_v18, %v1086_v23 }
 0x2fc   : > { %v1031_v26 = vpop.xlane.xlu1 %1030  ;;  %v1049_v24 = vpop.xlane.xlu0 %1048  ;;  %v1147_v35 = vsel %vm1146_vm3, %v1091_v30, %v1082_v27 }
 0x2fd   : > { %v1095_v28 = vrot.slane %v1031_v26, %v1074_v17  ;;  %v1135_v42 = vrot.slane %v1049_v24, %v1079_v1 }
 0x300   : > { %v1033_v61 = vpop.xlane.xlu1 %1032  ;;  %v1053_v43 = vpop.xlane.xlu0 %1052 }
 0x301   : > { %v1099_v19 = vrot.slane %v1033_v61, %v1079_v1  ;;  %v1144_v48 = vrot.slane %v1053_v43, %v1079_v1 }
 0x303   : > { %v1100_v32 = vsel %vm1081_vm2, %v1099_v19, %v1095_v28 }
 0x304   : > { %v1039_v8 = vpop.xlane.xlu1 %1038  ;;  %v1149_v39 = vsel %vm1148_vm4, %v1100_v32, %v1147_v35 }
 0x305   : > { %v1113_v36 = vrot.slane %v1039_v8, %v1074_v17 }
 0x307   : > { %v1118_v46 = vsel %vm1081_vm2, %v1117_v41, %v1113_v36 }
 0x308   : > { %v1035_v0 = vpop.xlane.xlu1 %1034 }
 0x309   : > { %v1104_v31 = vrot.slane %v1035_v0, %v1074_v17 }
 0x30c   : > { %v1037_v6 = vpop.xlane.xlu1 %1036 }
 0x30d   : > { %v1108_v25 = vrot.slane %v1037_v6, %v1079_v1 }
 0x30f   : > { %v1109_v33 = vsel %vm1081_vm2, %v1108_v25, %v1104_v31 }
 0x310   : > { %v1043_v29 = vpop.xlane.xlu1 %1042  ;;  %v1151_v44 = vsel %vm1150_vm5, %v1109_v33, %v1149_v39 }
 0x311   : > { %v1122_v34 = vrot.slane %v1043_v29, %v1074_v17  ;;  %v1153_v49 = vsel %vm1152_vm6, %v1118_v46, %v1151_v44 }
 0x313   : > { %v1127_v45 = vsel %vm1081_vm2, %v1126_v38, %v1122_v34 }
 0x314   : > { %v1047_v37 = vpop.xlane.xlu1 %1046  ;;  %v1155_v51 = vsel %vm1154_vm7, %v1127_v45, %v1153_v49 }
 0x315   : > { %v1131_v40 = vrot.slane %v1047_v37, %v1074_v17 }
 0x317   : > { %v1136_v21 = vsel %vm1081_vm2, %v1135_v42, %v1131_v40 }
 0x318   : > { %v1051_v47 = vpop.xlane.xlu1 %1050  ;;  %v1157_v2 = vsel %vm1156_vm8, %v1136_v21, %v1155_v51 }
 0x319   : > { %v1140_v50 = vrot.slane %v1051_v47, %v1074_v17 }
 0x31b   : > { %v1145_v4 = vsel %vm1081_vm2, %v1144_v48, %v1140_v50 }
 0x31c   : > { %v1159_v52 = vsel %vm1158_vm9, %v1145_v4, %v1157_v2 }
 0x31d   : > { %1161 = vst.msk [vmem:[%s216_s30] sm:$0xff] %vm228_vm1, %v1159_v52 }
 0x31e   : > { %1462 = shalt.err (!%p1459_p10)
}
 0x31f   : > { %s1463_s8 = scalar_lea.hbm %s1815_s9, 128  ;;  %s1467_s11 = scalar_lea.hbm %s1857_s4, 256 }
 0x320   : > { %p1464_p0 = scmp.ne.s32.totalorder %s1815_s9, %s1463_s8  ;;  %p1468_p1 = scmp.lt.s32.totalorder %s1815_s9, %s1857_s4 }
 0x321   : > { %p1469_p3 = scmp.lt.s32.totalorder %s1467_s11, %s1463_s8 }
 0x322   : > { %p1465_p2 = pnand %p1464_p0, %p1866_p12 }
 0x323   : > { %p1470_p6 = por %p1469_p3, %p1468_p1 }
 0x324   : > { %p1466_p9 = pneg %p1465_p2 }
 0x326   : > { %p1471_p11 = pnand %p1470_p6, %p1466_p9 }
 0x328   : > { %1474 = shalt.err (!%p1471_p11)
}
 0x329   : > { %1366 = dma.vmem_to_hbm [thread:$0]  (%p1866_p12), %s1177_s5, 128, %s1815_s9, %s1163_s19  }
 0x32a PF: > { %s1188_s25 = sand.u32 1, %s1501_s15   ;;  %p1867_p13 = scmp.ne.s32.totalorder %s1863_s28, 0 }
 0x32b   : > { %p1868_p4 = scmp.ge.s32.totalorder %s1513_s18, 2  ;;  %s1189_s29 = scalar_lea.sflag [#allocation5], %s1188_s25 }
 0x32d   : > { %p1373_p5 = pnand %p1868_p4, %p1867_p13 }
 0x32f   : > { %p1374_p7 = pneg %p1373_p5 }
 0x331   : > { %1496 = dma.done.wait (%p1374_p7), %s1189_s29, 128  }
 0x332   : > { %1498 = vsyncadd (%p1374_p7), %s1189_s29, 4294967168  ;;  %p17_p8 = scmp.ge.s32.totalorder %s1573_s21, 4   ;;  %s1869_s15 = smov %s1505_s16 }
 0x333   : > { %s1870_s16 = smov %s1509_s17  ;;  %s1871_s17 = smov %s1585_s24 }
 0x334   : > { %s1872_s18 = smov %s1573_s21  ;;  %19 = sbr.rel (!%p17_p8) target bundleno = 5 (0x5), region = 88 }
 0x339   :  { %1194 = vsyncpa [#allocation4], 1 }
 0x33a   :  { %1196 = vsyncpa [#allocation4 + $0x1], 1 }
 0x33b   :  { %1197 = vsyncpa [#allocation5], 1 }
 0x33c   :  { %1199 = vsyncpa [#allocation5 + $0x1], 1 }

</bundles_post_ra>
